<compile_context>
chip_gen: v6e
topology: v6e:2x2x1
jax: 0.10.0
libtpu: 0.0.40
codegen_flags: <defaults>
</compile_context>

<pallas_src>
import functools

import jax
import jax.numpy as jnp
from jax.experimental import pallas as pl
from jax.experimental.pallas import tpu as pltpu

_VMEM_LIMIT = 32 * 1024 * 1024


# ---------------------------------------------------------------------------
# Pass 1: per-(batch, channel) sum over the (padded) spatiotemporal axis,
#         fused with gate = sigmoid(W @ mean + b) on the final s step.
# ---------------------------------------------------------------------------
def _sum_gate_kernel(x_ref, w_ref, b_ref, gate_ref, acc_ref, *, inv_count):
    # x_ref   : (1, C, tS) input tile (zero-padded past true S)
    # w_ref   : (C, C)     fc weight, PyTorch (out_features, in_features) layout
    # b_ref   : (C, 1)     fc bias as a column
    # gate_ref: (1, C, 1)  f32 sigmoid gate (written only on the last s step)
    # acc_ref : (C, 1)     f32 running per-channel sum (VMEM scratch)
    s = pl.program_id(1)

    @pl.when(s == 0)
    def _():
        acc_ref[...] = jnp.zeros_like(acc_ref)

    acc_ref[...] += jnp.sum(x_ref[0].astype(jnp.float32), axis=-1,
                            keepdims=True)

    @pl.when(s == pl.num_programs(1) - 1)
    def _():
        mean = acc_ref[...] * inv_count                            # (C, 1)
        logits = jnp.dot(w_ref[...].astype(jnp.float32), mean,
                         preferred_element_type=jnp.float32)       # (C, 1)
        logits = logits + b_ref[...].astype(jnp.float32)
        gate_ref[...] = jax.nn.sigmoid(logits)[None]               # (1, C, 1)


# ---------------------------------------------------------------------------
# Pass 2: broadcast-multiply the gate over the spatiotemporal axis.
# ---------------------------------------------------------------------------
def _apply_kernel(gate_ref, x_ref, o_ref):
    # gate_ref: (1, C, 1) f32;  x_ref / o_ref: (1, C, tS) native dtype
    x = x_ref[...]
    gate = gate_ref[...].astype(x.dtype)
    o_ref[...] = gate * x


def self_gating(x, fc_weight, fc_bias, *, ts_target=512):
    """x: (B, C, T, H, W); fc_weight: (C, C) PyTorch layout; fc_bias: (C,)."""
    B, C, T, H, W = x.shape
    S = T * H * W
    dtype = x.dtype
    itemsize = jnp.dtype(dtype).itemsize

    # Lane-dense tiling: tS is a multiple of 128, capped both by ts_target and
    # by a VMEM budget (~4 MiB per (1, C, tS) block before double-buffering).
    s_rounded = ((S + 127) // 128) * 128
    vmem_cap = max(128, ((4 * 1024 * 1024) // (C * max(itemsize, 4)))
                   // 128 * 128)
    tS = min(ts_target, s_rounded, vmem_cap)
    S_pad = ((S + tS - 1) // tS) * tS
    n_s = S_pad // tS

    x_flat = x.reshape(B, C, S)
    if S_pad != S:
        x_flat = jnp.pad(x_flat, ((0, 0), (0, 0), (0, S_pad - S)))

    w = fc_weight.astype(jnp.float32)                 # (C_out, C_in)
    b_col = fc_bias.reshape(C, 1).astype(jnp.float32)

    # ---- pass 1: per-channel sums + gate ----------------------------------
    gates = pl.pallas_call(
        functools.partial(_sum_gate_kernel, inv_count=1.0 / float(S)),
        out_shape=jax.ShapeDtypeStruct((B, C, 1), jnp.float32),
        grid_spec=pltpu.PrefetchScalarGridSpec(
            num_scalar_prefetch=0,
            grid=(B, n_s),
            in_specs=[
                pl.BlockSpec((1, C, tS), lambda b, s: (b, 0, s)),
                pl.BlockSpec((C, C), lambda b, s: (0, 0)),
                pl.BlockSpec((C, 1), lambda b, s: (0, 0)),
            ],
            out_specs=pl.BlockSpec((1, C, 1), lambda b, s: (b, 0, 0)),
            scratch_shapes=[pltpu.VMEM((C, 1), jnp.float32)],
        ),
        compiler_params=pltpu.CompilerParams(
            dimension_semantics=("parallel", "arbitrary"),
            vmem_limit_bytes=_VMEM_LIMIT),
        cost_estimate=pl.CostEstimate(
            flops=B * C * S_pad + 2 * B * C * C,
            transcendentals=B * C,
            bytes_accessed=B * C * S_pad * itemsize
            + (C * C + C + B * C) * 4),
    )(x_flat, w, b_col)

    # ---- pass 2: apply the gate -------------------------------------------
    out_flat = pl.pallas_call(
        _apply_kernel,
        out_shape=jax.ShapeDtypeStruct((B, C, S_pad), dtype),
        grid_spec=pltpu.PrefetchScalarGridSpec(
            num_scalar_prefetch=0,
            grid=(B, n_s),
            in_specs=[
                pl.BlockSpec((1, C, 1), lambda b, s: (b, 0, 0)),
                pl.BlockSpec((1, C, tS), lambda b, s: (b, 0, s)),
            ],
            out_specs=pl.BlockSpec((1, C, tS), lambda b, s: (b, 0, s)),
        ),
        compiler_params=pltpu.CompilerParams(
            dimension_semantics=("parallel", "parallel"),
            vmem_limit_bytes=_VMEM_LIMIT),
        cost_estimate=pl.CostEstimate(
            flops=B * C * S_pad,
            transcendentals=0,
            bytes_accessed=2 * B * C * S_pad * itemsize + B * C * 4),
    )(gates, x_flat)

    if S_pad != S:
        out_flat = out_flat[:, :, :S]
    return out_flat.reshape(B, C, T, H, W)


def _reference(x, fc_weight, fc_bias):
    avg = jnp.mean(x, axis=(2, 3, 4))
    weights = jax.nn.sigmoid(avg @ fc_weight.T + fc_bias)
    return weights[:, :, None, None, None] * x


if __name__ == "__main__":
    key = jax.random.PRNGKey(0)
    B, C, T, H, W = 2, 4, 4, 8, 8

    kx, kw, kb = jax.random.split(key, 3)
    x = jax.random.normal(kx, (B, C, T, H, W), dtype=jnp.float32)
    # deterministic init mimicking nn.Linear defaults (uniform in +/- 1/sqrt(C))
    bound = 1.0 / float(C) ** 0.5
    fc_weight = jax.random.uniform(kw, (C, C), jnp.float32, -bound, bound)
    fc_bias = jax.random.uniform(kb, (C,), jnp.float32, -bound, bound)

    out = self_gating(x, fc_weight, fc_bias)
    out = jax.block_until_ready(out)

    ref = _reference(x, fc_weight, fc_bias)
    assert out.shape == (B, C, T, H, W)
    assert jnp.allclose(out, ref, atol=1e-5, rtol=1e-5), "mismatch vs reference"
    print("KERNEL_OK")
</pallas_src>

<mosaic_0001>
module attributes {stable_mosaic.version = 11 : i64} {
  func.func @_sum_gate_kernel(%arg0: i32, %arg1: i32, %arg2: memref<1x4x256xf32, #tpu.memory_space<vmem>>, %arg3: memref<4x4xf32, #tpu.memory_space<vmem>>, %arg4: memref<4x1xf32, #tpu.memory_space<vmem>>, %arg5: memref<1x4x1xf32, #tpu.memory_space<vmem>>, %arg6: memref<4x1xf32, #tpu.memory_space<vmem>>) attributes {dimension_semantics = [#tpu.dimension_semantics<parallel>, #tpu.dimension_semantics<arbitrary>], iteration_bounds = array<i64: 2, 1>, scalar_prefetch = 0 : i64, scratch_operands = 1 : i64, tpu.core_type = #tpu.core_type<tc>, window_params = [{transform_indices = @transform_0, window_bounds = array<i64: 1, 4, 256>}, {pipeline_mode = #tpu.pipeline_mode<synchronous>, transform_indices = @transform_1, window_bounds = array<i64: 4, 4>}, {pipeline_mode = #tpu.pipeline_mode<synchronous>, transform_indices = @transform_2, window_bounds = array<i64: 4, 1>}, {transform_indices = @transform_3, window_bounds = array<i64: 1, 4, 1>}]} {
    %c0_i32 = arith.constant 0 : i32
    %0 = arith.cmpi eq, %arg1, %c0_i32 : i32
    %1 = arith.extui %0 : i1 to i32
    %c0_i32_0 = arith.constant 0 : i32
    %2 = arith.cmpi ne, %1, %c0_i32_0 : i32
    scf.if %2 {
      %cst_9 = arith.constant 0.000000e+00 : f32
      %13 = vector.broadcast %cst_9 : f32 to vector<4x1xf32>
      %c0_10 = arith.constant 0 : index
      %c0_11 = arith.constant 0 : index
      %14 = vector.load %arg6[%c0_10, %c0_11] : memref<4x1xf32, #tpu.memory_space<vmem>>, vector<4x1xf32>
      tpu.vector_store %arg6[%c0_10, %c0_11], %13 {strides = array<i32>} : memref<4x1xf32, #tpu.memory_space<vmem>>, vector<4x1xf32>,
    } else {
    }
    %c0 = arith.constant 0 : index
    %c0_1 = arith.constant 0 : index
    %3 = vector.load %arg6[%c0, %c0_1] : memref<4x1xf32, #tpu.memory_space<vmem>>, vector<4x1xf32>
    %c0_2 = arith.constant 0 : index
    %c0_3 = arith.constant 0 : index
    %c0_4 = arith.constant 0 : index
    %4 = vector.load %arg2[%c0_2, %c0_3, %c0_4] : memref<1x4x256xf32, #tpu.memory_space<vmem>>, vector<1x4x256xf32>
    %5 = vector.shape_cast %4 : vector<1x4x256xf32> to vector<4x256xf32>
    %cst = arith.constant dense<0.000000e+00> : vector<4xf32>
    %6 = vector.multi_reduction <add>, %5, %cst [1] : vector<4x256xf32> to vector<4xf32>
    %7 = vector.shape_cast %6 : vector<4xf32> to vector<4x1xf32>
    %8 = arith.addf %3, %7 : vector<4x1xf32>
    %c0_5 = arith.constant 0 : index
    %c0_6 = arith.constant 0 : index
    %9 = vector.load %arg6[%c0_5, %c0_6] : memref<4x1xf32, #tpu.memory_space<vmem>>, vector<4x1xf32>
    tpu.vector_store %arg6[%c0_5, %c0_6], %8 {strides = array<i32>} : memref<4x1xf32, #tpu.memory_space<vmem>>, vector<4x1xf32>,
    %c0_i32_7 = arith.constant 0 : i32
    %10 = arith.cmpi eq, %arg1, %c0_i32_7 : i32
    %11 = arith.extui %10 : i1 to i32
    %c0_i32_8 = arith.constant 0 : i32
    %12 = arith.cmpi ne, %11, %c0_i32_8 : i32
    scf.if %12 {
      %c0_9 = arith.constant 0 : index
      %c0_10 = arith.constant 0 : index
      %13 = vector.load %arg6[%c0_9, %c0_10] : memref<4x1xf32, #tpu.memory_space<vmem>>, vector<4x1xf32>
      %cst_11 = arith.constant 3.906250e-03 : f32
      %14 = vector.broadcast %cst_11 : f32 to vector<4x1xf32>
      %15 = arith.mulf %13, %14 : vector<4x1xf32>
      %c0_12 = arith.constant 0 : index
      %c0_13 = arith.constant 0 : index
      %16 = vector.load %arg3[%c0_12, %c0_13] : memref<4x4xf32, #tpu.memory_space<vmem>>, vector<4x4xf32>
      %cst_14 = arith.constant dense<0.000000e+00> : vector<4x1xf32>
      %17 = tpu.matmul %16, %15, %cst_14 {dimension_numbers = #tpu.dot_dimension_numbers<[1], [0], [0], [1], [0, 0, 1, 1], [], []>} : vector<4x4xf32>, vector<4x1xf32>, vector<4x1xf32> -> vector<4x1xf32>
      %c0_15 = arith.constant 0 : index
      %c0_16 = arith.constant 0 : index
      %18 = vector.load %arg4[%c0_15, %c0_16] : memref<4x1xf32, #tpu.memory_space<vmem>>, vector<4x1xf32>
      %19 = arith.addf %17, %18 : vector<4x1xf32>
      %20 = arith.negf %19 : vector<4x1xf32>
      %21 = math.exp %20 : vector<4x1xf32>
      %cst_17 = arith.constant 1.000000e+00 : f32
      %22 = vector.broadcast %cst_17 : f32 to vector<4x1xf32>
      %23 = arith.addf %22, %21 : vector<4x1xf32>
      %24 = arith.divf %22, %23 : vector<4x1xf32>
      %25 = vector.shape_cast %24 : vector<4x1xf32> to vector<1x4x1xf32>
      %c0_18 = arith.constant 0 : index
      %c0_19 = arith.constant 0 : index
      %c0_20 = arith.constant 0 : index
      %26 = vector.load %arg5[%c0_18, %c0_19, %c0_20] : memref<1x4x1xf32, #tpu.memory_space<vmem>>, vector<1x4x1xf32>
      tpu.vector_store %arg5[%c0_18, %c0_19, %c0_20], %25 {strides = array<i32>} : memref<1x4x1xf32, #tpu.memory_space<vmem>>, vector<1x4x1xf32>,
    } else {
    }
    return
  }
  func.func @transform_0(%arg0: i32, %arg1: i32) -> (i32, i32, i32) {
    %c0_i32 = arith.constant 0 : i32
    %c0_i32_0 = arith.constant 0 : i32
    return %arg0, %c0_i32, %arg1 : i32, i32, i32
  }
  func.func @transform_1(%arg0: i32, %arg1: i32) -> (i32, i32) {
    %c0_i32 = arith.constant 0 : i32
    %c0_i32_0 = arith.constant 0 : i32
    %c0_i32_1 = arith.constant 0 : i32
    return %c0_i32, %c0_i32_0 : i32, i32
  }
  func.func @transform_2(%arg0: i32, %arg1: i32) -> (i32, i32) {
    %c0_i32 = arith.constant 0 : i32
    %c0_i32_0 = arith.constant 0 : i32
    %c0_i32_1 = arith.constant 0 : i32
    return %c0_i32, %c0_i32_0 : i32, i32
  }
  func.func @transform_3(%arg0: i32, %arg1: i32) -> (i32, i32, i32) {
    %c0_i32 = arith.constant 0 : i32
    %c0_i32_0 = arith.constant 0 : i32
    %c0_i32_1 = arith.constant 0 : i32
    return %arg0, %c0_i32, %c0_i32_0 : i32, i32, i32
  }
}

</mosaic_0001>

<bundles_post_ra>
// kernel: tpu_custom_call.1
= control target key start
LH: loop header
LB: loop body
LE: loop exit
PB: predicated region body
PF: predicated region fallthrough
CT: control target
= control target key end

     0   :  { %8 = vsyncpa [#allocation4], 0  ;;  %s691_s0 = inlined_call_operand.hbm [shape: f32[2,4,256], index: 0, kind: input, shape index: {}]   ;;  %s692_s1 = inlined_call_operand.vmem [shape: f32[4,4], index: 1, kind: input, shape index: {}]   ;;  %s693_s2 = inlined_call_operand.vmem [shape: f32[4,1], index: 2, kind: input, shape index: {}]   ;;  %s694_s3 = inlined_call_operand.vmem [shape: f32[2,4,1], index: 3, kind: output, shape index: {}]  }
   0x1   :  { %10 = vsyncpa [#allocation4 + $0x1], 0  ;;  %s579_s12 = smov 0   ;;  %s581_s13 = smov 0  }
   0x2   :  { %s583_s14 = smov 0   ;;  %s585_s15 = smov 0  }
   0x3   :  { %s587_s16 = smov 0   ;;  %s589_s17 = smov 0  }
   0x4 LB: > { %s391_s18 = sadd.s32 4294967295, %s554_s17   ;;  %s28_s19 = sadd.s32 1, %s550_s16  ;;  %s554_s17 = sphi %s589_s17, %s16_s17   ;;  %s550_s16 = sphi %s587_s16, %s702_s16   ;;  %s546_s15 = sphi %s585_s15, %s701_s15   ;;  %s542_s14 = sphi %s583_s14, %s700_s14   ;;  %s538_s13 = sphi %s581_s13, %s699_s13   ;;  %s534_s12 = sphi %s579_s12, %s698_s12  }
   0x5   : > { %p30_p0 = scmp.ge.s32.totalorder %s28_s19, 2  ;;  %s37_s20 = sadd.s32 1, %s542_s14 }
   0x6   : > { %p44_p1 = scmp.ne.s32.totalorder %s542_s14, %s538_s13  ;;  %p45_p2 = scmp.eq.s32.totalorder %s554_s17, 0 }
   0x7   : > { %s704_s19 = smov (%p30_p0, %s28_s19), 0  ;;  %p50_p4 = scmp.ne.s32.totalorder %s538_s13, %s534_s12 }
   0x8   : > { %p615_p3 = por %p45_p2, %p44_p1  ;;  %s32_s22 = ssub.s32 %s550_s16, %s704_s19 }
   0x9   : > { %p51_p5 = scmp.eq.s32.totalorder %s391_s18, 0  ;;  %p35_p6 = scmp.eq.s32.totalorder %s32_s22, 0 }
   0xa   : > { %p420_p8 = scmp.lt.s32.totalorder %s554_s17, 2  ;;  %s148_s25 = sand.u32 1, %s542_s14  }
   0xb   : > { %p622_p7 = por %p51_p5, %p50_p4  ;;  %s406_s26 = sshll.u32 %s550_s16, 7 }
   0xc   : > { %s628_s24 = scalar_select %p35_p6, %s542_s14, %s37_s20  }
   0xd   : > { %s395_s27 = sshll.u32 %s148_s25, 3  ;;  %s160_s30 = scalar_lea.hbm %s691_s0, %s406_s26 }
   0xe   : > { %s152_s4 = scalar_lea.vmem [#allocation3], %s395_s27  ;;  %p637_p9 = pnand %p420_p8, %p615_p3 }
   0xf   : > { %s162_s5 = sshll.u32 %s152_s4, 4  ;;  %p398_p10 = scmp.ge.s32.totalorder %s554_s17, 1  ;;  %s163_s5 = int_to_ptr.vmem [resolvable:$true] %s162_s5 }
  0x10   : > { %p167_p11 = scmp.lt.s32.totalorder %s554_s17, 3  ;;  %s149_s7 = scalar_lea.sflag [#allocation4], %s148_s25 }
  0x11   : > { %p478_p12 = pneg %p637_p9  ;;  %s489_s8 = scalar_lea.vmem %s163_s5, 128 }
  0x12   : > { %p490_p13 = scmp.ne.s32.totalorder %s163_s5, %s489_s8  ;;  %s556_s9 = smov [#allocation3]  }
  0x13   : > { %s494_s10 = sshll.u32 %s556_s9, 4  ;;  %s495_s10 = int_to_ptr.vmem [resolvable:$false] %s494_s10 }
  0x14   : > { %p492_p0 = pnand %p490_p13, %p478_p12  ;;  %s496_s11 = scalar_lea.vmem %s495_s10, 256 }
  0x15   : > { %p497_p2 = scmp.lt.s32.totalorder %s163_s5, %s495_s10  ;;  %p498_p3 = scmp.lt.s32.totalorder %s496_s11, %s489_s8 }
  0x16   : > { %p493_p1 = pneg %p492_p0 }
  0x17   : > { %p499_p4 = por %p498_p3, %p497_p2 }
  0x19   : > { %p500_p5 = pnand %p499_p4, %p493_p1 }
  0x1b   : > { %503 = shalt.err (!%p500_p5)
}
  0x1c   : > { %419 = dma.hbm_to_vmem [thread:$0]  (!%p637_p9), %s160_s30, 128, %s163_s5, %s149_s7  }
  0x1d   : > { %p168_p6 = pnand %p398_p10, %p167_p11 }
  0x1e   : > { %s173_s12 = sand.u32 (!%p168_p6), 1, %s538_s13  }
  0x1f   : > { %171 = sbr.rel (%p168_p6) target bundleno = 422 (0x1a6), region = 32  ;;  %s399_s18 = sshll.u32 (!%p168_p6), %s173_s12, 3 }
  0x20   : > { %s174_s20 = scalar_lea.sflag (!%p168_p6), [#allocation4], %s173_s12  ;;  %s177_s21 = scalar_lea.vmem (!%p168_p6), [#allocation3], %s399_s18 }
  0x24   : > { %529 = dma.done.wait (%p622_p7), %s174_s20, 128  }
  0x25   : > { %531 = vsyncadd (%p622_p7), %s174_s20, 4294967168  ;;  %vm208_vm0 = vcmask 3072   ;;  %v557_v0 = vmov 0.0   ;;  %vm215_vm1 = vcmask 1043456   ;;  %v211_v1 = vld [vmem:[%s177_s21] sm:$0xff]  ;;  %vm558_vm2 = vmmov 0  }
  0x26   : > { %209 = vst.msk [vmem:[#allocation2] sm:$0xf] %vm208_vm0, %v557_v0  ;;  %409 = vmatprep.subr.mxu0 %v557_v0  ;;  %v213_v2 = vcombine.high %v211_v1, %v211_v1  ;;  %v216_v3 = vsel %vm215_vm1, %v211_v1, 0.0  ;;  %411 = vmatprep.mubr.msk.f32.mxu0 %vm558_vm2, %v557_v0  ;;  %v229_v11 = vld [vmem:[%s692_s1] sm:$0xf]  ;;  %vm231_vm3 = vcmask 31744  }
  0x27   : > { %v230_v12 = vld [vmem:[%s693_s2] sm:$0xf]  ;;  %p200_p7 = scmp.lt.s32.totalorder %s546_s15, 1 }
  0x28   : > { %v217_v4 = vsel %vm215_vm1, %v213_v2, 0.0 }
  0x29   : > { %v218_v5 = vadd.f32 %v217_v4, %v216_v3  ;;  %s706_s15 = smov (!%p200_p7, %s546_s15), 1 }
  0x2a   : > { %s400_s27 = sshll.u32 %s706_s15, 2 }
  0x2b   : > { %219 = vadd.xlane.f32.xlu0 %v218_v5  ;;  %s203_s30 = scalar_lea.vmem %s694_s3, %s400_s27 }
  0x2d   : > { %v210_v6 = vld [vmem:[#allocation2] sm:$0xf] }
  0xb4   : > { %v220_v7 = vpop.xlane.xlu0 %219 }
  0xb5   : > { %v221_v8 = vadd.f32 %v220_v7, %v210_v6 }
  0xb7   : > { %223 = vst.msk [vmem:[#allocation2] sm:$0xf] %vm208_vm0, %v221_v8 }
  0xbe   : > { %v227_v9 = vld [vmem:[#allocation2] sm:$0xf] }
  0xbf   : > { %v228_v10 = vmul.f32 0.00390625, %v227_v9 }
  0xc1   : > { %410 = vmatpush3.msk.msra.mxu0 %vm215_vm1, %v228_v10 }
  0xc2   : > { %412 = vmatmul.mubr.msk.f32.vlgmr.msra.gmra.mxu0 %vm231_vm3, %v229_v11 }
 0x182   : > { %v304_v13 = vpop.f32.mrf.mxu0 }
 0x183   : > { %v305_v14 = vadd.f32 %v304_v13, %v230_v12 }
 0x184   : > { %v413_v15 = vpop.f32.mrf.mxu0 }
 0x185   : > { %v403_v16 = vmul.f32 -1.442695, %v305_v14 }
 0x187   : > { %472 = vpow2.f32 %v403_v16 }
 0x194   : > { %v473_v17 = vpop.eup %472 }
 0x195   : > { %v311_v18 = vadd.f32 1.0, %v473_v17 }
 0x197   : > { %474 = vrcp.f32 %v311_v18 }
 0x1a4   : > { %v475_v19 = vpop.eup %474 }
 0x1a5   : > { %314 = vst.msk [vmem:[%s203_s30] sm:$0xf] %vm208_vm0, %v475_v19 }
 0x1a6 PF: > { %s16_s17 = sadd.s32 1, %s554_s17   ;;  %s698_s12 = smov %s538_s13 }
 0x1a7   : > { %p13_p8 = scmp.ge.s32.totalorder %s16_s17, 4   ;;  %s699_s13 = smov %s542_s14 }
 0x1a8   : > { %s700_s14 = smov %s628_s24  ;;  %s701_s15 = smov %s550_s16 }
 0x1a9   : > { %s702_s16 = smov %s704_s19  ;;  %15 = sbr.rel (!%p13_p8) target bundleno = 4 (0x4), region = 80 }
 0x1ae   :  { %334 = vsyncpa [#allocation4], 1 }
 0x1af   :  { %336 = vsyncpa [#allocation4 + $0x1], 1 }

</bundles_post_ra>
